<compile_context>
chip_gen: v5e
topology: v5e:2x2
jax: 0.10.0
libtpu: 0.0.40
codegen_flags: <defaults>
</compile_context>

<pallas_src>
import functools

import jax
import jax.numpy as jnp
from jax.experimental import pallas as pl
from jax.experimental.pallas import tpu as pltpu


def _round_up(x, m):
    return ((x + m - 1) // m) * m


def _cdiv(a, b):
    return -(-a // b)


def _vmem_budget():
    """Return (target_tile_bytes, vmem_limit_bytes) from the chip's VMEM size."""
    vmem_cap = None
    try:
        info = pltpu.get_tpu_info()
        for attr in ("vmem_capacity_bytes", "vmem_size_bytes", "vmem_bytes"):
            v = getattr(info, attr, None)
            if isinstance(v, int) and v > 0:
                vmem_cap = v
                break
    except Exception:
        vmem_cap = None
    if vmem_cap is None:
        # Conservative fallback: assume the smallest per-core VMEM (v7x, 64 MiB).
        vmem_cap = 64 * 1024 * 1024
    target_tile_bytes = max(2 << 20, min(8 << 20, vmem_cap // 16))
    vmem_limit_bytes = int(min(vmem_cap // 2, 64 << 20))
    return target_tile_bytes, vmem_limit_bytes


def _mean_rows_kernel(x_ref, o_ref, acc_ref, *, inv_s):
    """Full-spatial-row path: x_ref (r_blk, S), o_ref (r_blk, 1).

    The block's last dim equals the full array dim, so every lane is valid
    (no mask needed).  Chunks accumulate straight into the VMEM scratch to
    avoid a long-lived register accumulator across the unrolled loop.
    """
    blk_w = x_ref.shape[1]
    n_full = blk_w // 128
    rem = blk_w % 128

    acc_ref[...] = jnp.zeros_like(acc_ref)
    for ci in range(n_full):
        acc_ref[...] += x_ref[:, ci * 128:(ci + 1) * 128].astype(jnp.float32)

    total = jnp.sum(acc_ref[...], axis=-1, keepdims=True)  # single XLU reduce
    if rem:
        total = total + jnp.sum(
            x_ref[:, n_full * 128:].astype(jnp.float32), axis=-1, keepdims=True)
    o_ref[...] = (total * inv_s).astype(o_ref.dtype)


def _mean_tiled_kernel(x_ref, o_ref, acc_ref, *, true_s, s_blk, need_mask, inv_s):
    """Spatially tiled path: x_ref (r_blk, s_blk), s_blk a multiple of 128.

    The last spatial block may contain garbage lanes past true_s (BlockSpec
    boundary read); they are zeroed with a lane-validity mask before
    accumulation.  Output tile is resident across the k (reduction) axis.
    """
    k = pl.program_id(1)

    @pl.when(k == 0)
    def _():
        acc_ref[...] = jnp.zeros_like(acc_ref)

    r_blk = x_ref.shape[0]
    if need_mask:
        lane = jax.lax.broadcasted_iota(jnp.int32, (r_blk, 128), 1)  # hoisted
        base = k * s_blk

    for ci in range(s_blk // 128):
        chunk = x_ref[:, ci * 128:(ci + 1) * 128].astype(jnp.float32)
        if need_mask:
            chunk = jnp.where(base + ci * 128 + lane < true_s, chunk, 0.0)
        acc_ref[...] += chunk  # accumulate in VMEM scratch, not registers

    @pl.when(k == pl.num_programs(1) - 1)
    def _():
        total = jnp.sum(acc_ref[...], axis=-1, keepdims=True)
        o_ref[...] = (total * inv_s).astype(o_ref.dtype)


def fast_adaptive_avg_pool3d(x, flatten: bool = False, *, spatial_block=None):
    """x: (N, C, D, H, W) -> (N, C, 1, 1, 1) if not flatten else (N, C).

    spatial_block: optional override that forces the spatially-tiled path with
    the given lane-block size (rounded up to 128).  Used for testing.
    """
    n, c, d, h, w = x.shape
    s = d * h * w
    r = n * c
    x2 = x.reshape(r, s)            # rows = N*C, reduction axis last (lane-dense)
    inv_s = 1.0 / float(s)

    itemsize = jnp.dtype(x.dtype).itemsize
    sub = {4: 8, 2: 16, 1: 32}.get(itemsize, 8)   # sublane packing multiple

    target_tile_bytes, vmem_limit_bytes = _vmem_budget()
    row_bytes = _round_up(s, 128) * itemsize      # VMEM bytes of one padded row

    use_full_rows = (spatial_block is None) and (row_bytes * sub <= target_tile_bytes)
    if use_full_rows:
        s_blk = s                                  # full dim: contiguous row DMAs
        r_blk = max(sub, (target_tile_bytes // row_bytes) // sub * sub)
    else:
        if spatial_block is not None:
            s_blk = _round_up(max(int(spatial_block), 128), 128)
        else:
            s_blk = min(_round_up(s, 128), 4096)
        r_blk = max(sub, (target_tile_bytes // (s_blk * itemsize)) // sub * sub)

    # Never use more rows per block than exist; keep >= 2 row blocks when the
    # problem is big enough so the "parallel" axis shards across v7x's 2 TCs.
    r_blk = min(r_blk, _round_up(r, sub))
    if r > 2 * sub:
        r_blk = min(r_blk, _round_up(_cdiv(r, 2), sub))

    r_pad = _round_up(r, r_blk)     # output-only padding; input x is NOT copied
    grid_r = r_pad // r_blk

    if use_full_rows:
        out = pl.pallas_call(
            functools.partial(_mean_rows_kernel, inv_s=inv_s),
            out_shape=jax.ShapeDtypeStruct((r_pad, 1), x.dtype),
            grid_spec=pltpu.PrefetchScalarGridSpec(
                num_scalar_prefetch=0,
                grid=(grid_r,),
                in_specs=[pl.BlockSpec((r_blk, s_blk), lambda i: (i, 0))],
                out_specs=pl.BlockSpec((r_blk, 1), lambda i: (i, 0)),
                scratch_shapes=[pltpu.VMEM((r_blk, 128), jnp.float32)],
            ),
            compiler_params=pltpu.CompilerParams(
                dimension_semantics=("parallel",),
                vmem_limit_bytes=vmem_limit_bytes,
            ),
        )(x2)
    else:
        grid_k = _cdiv(s, s_blk)
        need_mask = (s % s_blk) != 0
        out = pl.pallas_call(
            functools.partial(_mean_tiled_kernel, true_s=s, s_blk=s_blk,
                              need_mask=need_mask, inv_s=inv_s),
            out_shape=jax.ShapeDtypeStruct((r_pad, 1), x.dtype),
            grid_spec=pltpu.PrefetchScalarGridSpec(
                num_scalar_prefetch=0,
                grid=(grid_r, grid_k),
                in_specs=[pl.BlockSpec((r_blk, s_blk), lambda i, k: (i, k))],
                out_specs=pl.BlockSpec((r_blk, 1), lambda i, k: (i, 0)),
                scratch_shapes=[pltpu.VMEM((r_blk, 128), jnp.float32)],
            ),
            compiler_params=pltpu.CompilerParams(
                dimension_semantics=("parallel", "arbitrary"),
                vmem_limit_bytes=vmem_limit_bytes,
            ),
        )(x2)

    out = out[:r, 0].reshape(n, c)
    if flatten:
        return out                     # (N, C)
    return out.reshape(n, c, 1, 1, 1)  # keepdim=True


if __name__ == "__main__":
    key = jax.random.PRNGKey(0)
    k1, k2, k3 = jax.random.split(key, 3)

    # Case 1: f32, nicely divisible shapes (full-row path). N=2, C=4, D=H=W=8.
    x = jax.random.normal(k1, (2, 4, 8, 8, 8), dtype=jnp.float32)
    y = jax.block_until_ready(fast_adaptive_avg_pool3d(x, flatten=False))
    y_ref = jnp.mean(x, axis=(2, 3, 4), keepdims=True)
    assert y.shape == (2, 4, 1, 1, 1), y.shape
    assert jnp.allclose(y, y_ref, atol=1e-5, rtol=1e-5)

    y_flat = jax.block_until_ready(fast_adaptive_avg_pool3d(x, flatten=True))
    assert y_flat.shape == (2, 4), y_flat.shape
    assert jnp.allclose(y_flat, jnp.mean(x, axis=(2, 3, 4)), atol=1e-5, rtol=1e-5)

    # Case 2: non-divisible rows / spatial size, no input padding anywhere.
    x2 = jax.random.normal(k2, (2, 3, 5, 6, 7), dtype=jnp.float32)
    y2 = jax.block_until_ready(fast_adaptive_avg_pool3d(x2, flatten=False))
    y2_ref = jnp.mean(x2, axis=(2, 3, 4), keepdims=True)
    assert y2.shape == (2, 3, 1, 1, 1), y2.shape
    assert jnp.allclose(y2, y2_ref, atol=1e-5, rtol=1e-5)

    # Case 3: bf16 input (f32 accumulation in-kernel, bf16 result like PyTorch).
    x3 = jax.random.normal(k3, (2, 4, 8, 8, 8), dtype=jnp.bfloat16)
    y3 = jax.block_until_ready(fast_adaptive_avg_pool3d(x3, flatten=True))
    y3_ref = jnp.mean(x3.astype(jnp.float32), axis=(2, 3, 4))
    assert y3.shape == (2, 4), y3.shape
    assert jnp.allclose(y3.astype(jnp.float32), y3_ref, atol=1e-2, rtol=1e-2)

    # Case 4: force the spatially-tiled path (k reduction axis + ragged-tail
    # lane mask) on small data: S=210 with s_blk=128 -> 2 k-blocks, masked tail.
    y4 = jax.block_until_ready(
        fast_adaptive_avg_pool3d(x2, flatten=False, spatial_block=128))
    assert y4.shape == (2, 3, 1, 1, 1), y4.shape
    assert jnp.allclose(y4, y2_ref, atol=1e-5, rtol=1e-5)

    print("KERNEL_OK")
</pallas_src>

<mosaic_0001>
module attributes {stable_mosaic.version = 11 : i64} {
  func.func @_mean_rows_kernel(%arg0: i32, %arg1: memref<8x512xf32, #tpu.memory_space<vmem>>, %arg2: memref<8x1xf32, #tpu.memory_space<vmem>>, %arg3: memref<8x128xf32, #tpu.memory_space<vmem>>) attributes {dimension_semantics = [#tpu.dimension_semantics<parallel>], iteration_bounds = array<i64: 1>, scalar_prefetch = 0 : i64, scratch_operands = 1 : i64, tpu.core_type = #tpu.core_type<tc>, window_params = [{transform_indices = @transform_0, window_bounds = array<i64: 8, 512>}, {transform_indices = @transform_1, window_bounds = array<i64: 8, 1>}]} {
    %cst = arith.constant 0.000000e+00 : f32
    %0 = vector.broadcast %cst : f32 to vector<8x128xf32>
    %c0 = arith.constant 0 : index
    %c0_0 = arith.constant 0 : index
    %1 = vector.load %arg3[%c0, %c0_0] : memref<8x128xf32, #tpu.memory_space<vmem>>, vector<8x128xf32>
    tpu.vector_store %arg3[%c0, %c0_0], %0 {strides = array<i32>} : memref<8x128xf32, #tpu.memory_space<vmem>>, vector<8x128xf32>,
    %c0_1 = arith.constant 0 : index
    %c0_2 = arith.constant 0 : index
    %2 = vector.load %arg3[%c0_1, %c0_2] : memref<8x128xf32, #tpu.memory_space<vmem>>, vector<8x128xf32>
    %c0_3 = arith.constant 0 : index
    %c0_4 = arith.constant 0 : index
    %3 = vector.load %arg1[%c0_3, %c0_4] : memref<8x512xf32, #tpu.memory_space<vmem>>, vector<8x128xf32>
    %4 = arith.addf %2, %3 : vector<8x128xf32>
    %c0_5 = arith.constant 0 : index
    %c0_6 = arith.constant 0 : index
    %5 = vector.load %arg3[%c0_5, %c0_6] : memref<8x128xf32, #tpu.memory_space<vmem>>, vector<8x128xf32>
    tpu.vector_store %arg3[%c0_5, %c0_6], %4 {strides = array<i32>} : memref<8x128xf32, #tpu.memory_space<vmem>>, vector<8x128xf32>,
    %c0_7 = arith.constant 0 : index
    %c0_8 = arith.constant 0 : index
    %6 = vector.load %arg3[%c0_7, %c0_8] : memref<8x128xf32, #tpu.memory_space<vmem>>, vector<8x128xf32>
    %c0_9 = arith.constant 0 : index
    %c128 = arith.constant 128 : index
    %7 = vector.load %arg1[%c0_9, %c128] : memref<8x512xf32, #tpu.memory_space<vmem>>, vector<8x128xf32>
    %8 = arith.addf %6, %7 : vector<8x128xf32>
    %c0_10 = arith.constant 0 : index
    %c0_11 = arith.constant 0 : index
    %9 = vector.load %arg3[%c0_10, %c0_11] : memref<8x128xf32, #tpu.memory_space<vmem>>, vector<8x128xf32>
    tpu.vector_store %arg3[%c0_10, %c0_11], %8 {strides = array<i32>} : memref<8x128xf32, #tpu.memory_space<vmem>>, vector<8x128xf32>,
    %c0_12 = arith.constant 0 : index
    %c0_13 = arith.constant 0 : index
    %10 = vector.load %arg3[%c0_12, %c0_13] : memref<8x128xf32, #tpu.memory_space<vmem>>, vector<8x128xf32>
    %c0_14 = arith.constant 0 : index
    %c256 = arith.constant 256 : index
    %11 = vector.load %arg1[%c0_14, %c256] : memref<8x512xf32, #tpu.memory_space<vmem>>, vector<8x128xf32>
    %12 = arith.addf %10, %11 : vector<8x128xf32>
    %c0_15 = arith.constant 0 : index
    %c0_16 = arith.constant 0 : index
    %13 = vector.load %arg3[%c0_15, %c0_16] : memref<8x128xf32, #tpu.memory_space<vmem>>, vector<8x128xf32>
    tpu.vector_store %arg3[%c0_15, %c0_16], %12 {strides = array<i32>} : memref<8x128xf32, #tpu.memory_space<vmem>>, vector<8x128xf32>,
    %c0_17 = arith.constant 0 : index
    %c0_18 = arith.constant 0 : index
    %14 = vector.load %arg3[%c0_17, %c0_18] : memref<8x128xf32, #tpu.memory_space<vmem>>, vector<8x128xf32>
    %c0_19 = arith.constant 0 : index
    %c384 = arith.constant 384 : index
    %15 = vector.load %arg1[%c0_19, %c384] : memref<8x512xf32, #tpu.memory_space<vmem>>, vector<8x128xf32>
    %16 = arith.addf %14, %15 : vector<8x128xf32>
    %c0_20 = arith.constant 0 : index
    %c0_21 = arith.constant 0 : index
    %17 = vector.load %arg3[%c0_20, %c0_21] : memref<8x128xf32, #tpu.memory_space<vmem>>, vector<8x128xf32>
    tpu.vector_store %arg3[%c0_20, %c0_21], %16 {strides = array<i32>} : memref<8x128xf32, #tpu.memory_space<vmem>>, vector<8x128xf32>,
    %c0_22 = arith.constant 0 : index
    %c0_23 = arith.constant 0 : index
    %18 = vector.load %arg3[%c0_22, %c0_23] : memref<8x128xf32, #tpu.memory_space<vmem>>, vector<8x128xf32>
    %cst_24 = arith.constant dense<0.000000e+00> : vector<8xf32>
    %19 = vector.multi_reduction <add>, %18, %cst_24 [1] : vector<8x128xf32> to vector<8xf32>
    %20 = vector.shape_cast %19 : vector<8xf32> to vector<8x1xf32>
    %cst_25 = arith.constant 0.001953125 : f32
    %21 = vector.broadcast %cst_25 : f32 to vector<8x1xf32>
    %22 = arith.mulf %20, %21 : vector<8x1xf32>
    %c0_26 = arith.constant 0 : index
    %c0_27 = arith.constant 0 : index
    %23 = vector.load %arg2[%c0_26, %c0_27] : memref<8x1xf32, #tpu.memory_space<vmem>>, vector<8x1xf32>
    tpu.vector_store %arg2[%c0_26, %c0_27], %22 {strides = array<i32>} : memref<8x1xf32, #tpu.memory_space<vmem>>, vector<8x1xf32>,
    return
  }
  func.func @transform_0(%arg0: i32) -> (i32, i32) {
    %c0_i32 = arith.constant 0 : i32
    %c0_i32_0 = arith.constant 0 : i32
    return %arg0, %c0_i32 : i32, i32
  }
  func.func @transform_1(%arg0: i32) -> (i32, i32) {
    %c0_i32 = arith.constant 0 : i32
    %c0_i32_0 = arith.constant 0 : i32
    return %arg0, %c0_i32 : i32, i32
  }
}

</mosaic_0001>

<bundles_post_ra>
// kernel: tpu_custom_call.1
= control target key start
LH: loop header
LB: loop body
LE: loop exit
PB: predicated region body
PF: predicated region fallthrough
CT: control target
= control target key end

     0   :  { %6 = vsyncpa [#allocation4], 0  ;;  %s77_s9 = smov [#allocation3]   ;;  %s94_s0 = inlined_call_operand.hbm [shape: f32[8,512], index: 0, kind: input, shape index: {}]   ;;  %s95_s1 = inlined_call_operand.vmem [shape: f32[8,1], index: 1, kind: output, shape index: {}]  }
   0x1   :  { %s12_s8 = sshll.u32 %s94_s0, 4  ;;  %s14_s10 = sshll.u32 %s77_s9, 4  ;;  %s13_s8 = int_to_ptr.hbm [resolvable:$true] %s12_s8  ;;  %s15_s10 = int_to_ptr.vmem [resolvable:$true] %s14_s10 }
   0x2   :  { %17 = dma.hbm_to_vmem [thread:$0]  %s13_s8, 512, %s15_s10, [#allocation4]  }
   0x3   :  { %75 = dma.done.wait [#allocation4], 512  }
   0x4   :  { %76 = vsyncadd [#allocation4], 4294966784  ;;  %v24_v0 = vld [vmem:[#allocation3] sm:$0xff]  ;;  %v28_v1 = vld [vmem:[#allocation3 + $0x8] sm:$0xff]  ;;  %vm43_vm0 = vcmask 7168  }
   0x5   :  { %v32_v2 = vld [vmem:[#allocation3 + $0x10] sm:$0xff]  ;;  %v29_v3 = vadd.f32 %v28_v1, %v24_v0  ;;  %v36_v4 = vld [vmem:[#allocation3 + $0x18] sm:$0xff] }
   0x7   :  { %v33_v5 = vadd.f32 %v32_v2, %v29_v3 }
   0x9   :  { %v37_v6 = vadd.f32 %v36_v4, %v33_v5 }
   0xb   :  { %40 = vadd.xlane.f32.xlu0 %v37_v6 }
  0x7e   :  { %v41_v7 = vpop.xlane.xlu0 %40 }
  0x7f   :  { %v42_v8 = vmul.f32 0.001953125, %v41_v7 }
  0x81   :  { %44 = vst.msk [vmem:[%s95_s1] sm:$0xff] %vm43_vm0, %v42_v8 }
  0x82   :  { %49 = vsyncpa [#allocation4], 1 }

</bundles_post_ra>
